<compile_context>
chip_gen: v7x
topology: tpu7x:2x2x1
jax: 0.10.0
libtpu: 0.0.40
codegen_flags: <defaults>
</compile_context>

<pallas_src>
import math

import numpy as np
import jax
import jax.numpy as jnp
from jax.experimental import pallas as pl
from jax.experimental.pallas import tpu as pltpu

WINDOW_SIZE = 11
SIGMA = 1.5
C1 = 0.01 ** 2
C2 = 0.03 ** 2


def gaussian_1d(window_size, sigma):
    # Matches gaussian() in the PyTorch code (note: window_size / 2, not //).
    g = np.array(
        [math.exp(-((x - window_size / 2) ** 2) / (2.0 * sigma ** 2))
         for x in range(window_size)],
        dtype=np.float64,
    )
    g = g / g.sum()
    return g.astype(np.float32)


def conv_matrix_left(n, g1d):
    """Banded matrix M (n, n) such that M @ x applies the zero-padded 'same'
    cross-correlation with g1d along axis 0 (exactly F.conv2d's behaviour)."""
    ws = len(g1d)
    pad = ws // 2
    m = np.zeros((n, n), dtype=np.float32)
    for i in range(n):
        for t in range(ws):
            k = i + t - pad
            if 0 <= k < n:
                m[i, k] += float(g1d[t])
    return m


def choose_n_pack(n_img, w):
    """Images are packed side-by-side along the lane axis; prefer L = n_pack*W
    to be a multiple of 128 (vreg lane width) so every lane slice is aligned."""
    for d in range(1, n_img + 1):
        if n_img % d == 0 and (d * w) % 128 == 0 and d * w <= 2048:
            return d
    best = 1
    for d in range(1, n_img + 1):
        if n_img % d == 0 and d * w <= 128:
            best = d
    return best


def make_ssim_kernel(H, L, Gb, fused_vertical):
    GH = Gb * H

    def kernel(a_ref, b_ref, x1_ref, x2_ref, o_ref, s_ref, v_ref):
        # (Gb, H, L) -> (Gb*H, L): leading-dim collapse (layout-free for H%8==0).
        p1 = x1_ref[...].reshape(GH, L)
        p2 = x2_ref[...].reshape(GH, L)

        # Stage the 5 conv fields into S scratch, group-major
        # (rows [g*5H + f*H, ...)), without a jnp.concatenate copy.
        for g in range(Gb):
            a = p1[g * H:(g + 1) * H, :]
            b = p2[g * H:(g + 1) * H, :]
            base = g * 5 * H
            s_ref[base + 0 * H: base + 1 * H, :] = a
            s_ref[base + 1 * H: base + 2 * H, :] = b
            s_ref[base + 2 * H: base + 3 * H, :] = a * a
            s_ref[base + 3 * H: base + 4 * H, :] = b * b
            s_ref[base + 4 * H: base + 5 * H, :] = a * b

        # Vertical zero-padded Gaussian pass on the MXU.  Results are written
        # into V in FIELD-major order so the elementwise SSIM math below runs
        # fully vectorised across all Gb groups.
        for g in range(Gb):
            base = g * 5 * H
            if fused_vertical:
                vg = jnp.dot(a_ref[...], s_ref[base: base + 5 * H, :],
                             preferred_element_type=jnp.float32)
                if Gb == 1:
                    v_ref[...] = vg
                else:
                    for f in range(5):
                        v_ref[f * GH + g * H: f * GH + (g + 1) * H, :] = \
                            vg[f * H:(f + 1) * H, :]
            else:
                for f in range(5):
                    v_ref[f * GH + g * H: f * GH + (g + 1) * H, :] = jnp.dot(
                        a_ref[...], s_ref[base + f * H: base + (f + 1) * H, :],
                        preferred_element_type=jnp.float32)

        # Horizontal zero-padded Gaussian pass: ONE fused MXU matmul for all
        # five fields and all Gb groups (M = 5*Gb*H, K = N = L).
        conv = jnp.dot(v_ref[...], b_ref[...], preferred_element_type=jnp.float32)

        mu1 = conv[0 * GH:1 * GH, :]
        mu2 = conv[1 * GH:2 * GH, :]
        e11 = conv[2 * GH:3 * GH, :]
        e22 = conv[3 * GH:4 * GH, :]
        e12 = conv[4 * GH:5 * GH, :]

        mu1_sq = mu1 * mu1
        mu2_sq = mu2 * mu2
        mu1_mu2 = mu1 * mu2
        # Zero-padding commutes with elementwise products, so these equal
        # F.conv2d(img*img, window, padding=ws//2) - mu^2 exactly.
        sigma1_sq = e11 - mu1_sq
        sigma2_sq = e22 - mu2_sq
        sigma12 = e12 - mu1_mu2

        num = (2.0 * mu1_mu2 + C1) * (2.0 * sigma12 + C2)
        den = (mu1_sq + mu2_sq + C1) * (sigma1_sq + sigma2_sq + C2)
        r = pl.reciprocal(den, approx=True)
        r = r * (2.0 - den * r)          # one Newton step -> ~f32 accuracy (EUP slot)
        ssim_map = num * r

        # Lane-dense per-step partial column sums; the mean is finished in JAX.
        o_ref[...] = jnp.sum(ssim_map, axis=0, keepdims=True)

    return kernel


def ssim_pallas(img1, img2, window_size=WINDOW_SIZE):
    assert img1.shape == img2.shape
    B, C, H, W = img1.shape
    g1d = gaussian_1d(window_size, SIGMA)

    n_img = B * C
    n_pack = choose_n_pack(n_img, W)
    G = n_img // n_pack
    L = n_pack * W

    x1 = img1.astype(jnp.float32).reshape(n_img, H, W)
    x2 = img2.astype(jnp.float32).reshape(n_img, H, W)
    if n_pack > 1:
        x1 = x1.reshape(G, n_pack, H, W).transpose(0, 2, 1, 3).reshape(G, H, L)
        x2 = x2.reshape(G, n_pack, H, W).transpose(0, 2, 1, 3).reshape(G, H, L)
    else:
        x1 = x1.reshape(G, H, L)
        x2 = x2.reshape(G, H, L)

    # Banded "same"-padding conv matrices (asymmetric gaussian handled exactly).
    A = conv_matrix_left(H, g1d)                       # vertical:  out = A @ X
    Bw = conv_matrix_left(W, g1d).T                    # horizontal: out = X @ Bw
    Bblk = np.kron(np.eye(n_pack, dtype=np.float32), Bw).astype(np.float32)

    # Fuse the vertical pass across the 5 fields with a block-diagonal matrix
    # when it stays small; otherwise loop fields with the plain (H, H) matrix.
    fused_vertical = (5 * H) <= 1280                   # kron(I_5, A) <= ~6.5 MiB
    if fused_vertical:
        Amat = np.kron(np.eye(5, dtype=np.float32), A).astype(np.float32)
    else:
        Amat = A
    AH = Amat.shape[0]

    # Groups per grid step: largest divisor of G that fits the VMEM budget
    # (double-buffered x tiles + S/V scratch + conv intermediates), capped so
    # the unrolled per-group loop stays small.
    const_bytes = (AH * AH + L * L) * 4
    per_group_bytes = 96 * H * L                       # ~(x dbl-buf + S + V + conv + temps) bytes
    budget = 36 * 1024 * 1024
    gb_cap = 8
    gb_max = int(max(1, min(gb_cap, (budget - const_bytes) // max(per_group_bytes, 1))))
    Gb = 1
    for d in range(1, G + 1):
        if G % d == 0 and d <= gb_max:
            Gb = d
    nsteps = G // Gb

    kernel = make_ssim_kernel(H, L, Gb, fused_vertical)
    partials = pl.pallas_call(
        kernel,
        out_shape=jax.ShapeDtypeStruct((nsteps, 1, L), jnp.float32),
        grid=(nsteps,),
        in_specs=[
            # Resident constants: constant index_map + single buffer (no wasted
            # double-buffer VMEM).
            pl.BlockSpec((AH, AH), lambda i: (0, 0), pipeline_mode=pl.Buffered(1)),
            pl.BlockSpec((L, L), lambda i: (0, 0), pipeline_mode=pl.Buffered(1)),
            # Pipelined (double-buffered) image tiles, Gb packed groups / step.
            pl.BlockSpec((Gb, H, L), lambda i: (i, 0, 0)),
            pl.BlockSpec((Gb, H, L), lambda i: (i, 0, 0)),
        ],
        out_specs=pl.BlockSpec((None, 1, L), lambda i: (i, 0, 0)),
        scratch_shapes=[
            pltpu.VMEM((Gb * 5 * H, L), jnp.float32),  # staged conv fields S
            pltpu.VMEM((Gb * 5 * H, L), jnp.float32),  # vertical-pass results V
        ],
        compiler_params=pltpu.CompilerParams(
            dimension_semantics=("parallel",),         # independent steps -> megacore
            vmem_limit_bytes=48 * 1024 * 1024,
        ),
    )(jnp.asarray(Amat), jnp.asarray(Bblk), x1, x2)

    # size_average=True -> mean over all B*C*H*W elements.
    return jnp.sum(partials) / float(B * C * H * W)


def ssim_ref(img1, img2, window_size=WINDOW_SIZE):
    # Pure-JAX reference mirroring F.conv2d(..., groups=channel).
    B, C, H, W = img1.shape
    pad = window_size // 2
    g1d = gaussian_1d(window_size, SIGMA)
    w2d = np.outer(g1d, g1d).astype(np.float32)
    w = jnp.asarray(np.broadcast_to(w2d, (C, 1, window_size, window_size)))

    def conv(x):
        return jax.lax.conv_general_dilated(
            x, w, window_strides=(1, 1), padding=[(pad, pad), (pad, pad)],
            feature_group_count=C,
            dimension_numbers=("NCHW", "OIHW", "NCHW"),
        )

    mu1 = conv(img1)
    mu2 = conv(img2)
    mu1_sq = mu1 ** 2
    mu2_sq = mu2 ** 2
    mu1_mu2 = mu1 * mu2
    sigma1_sq = conv(img1 * img1) - mu1_sq
    sigma2_sq = conv(img2 * img2) - mu2_sq
    sigma12 = conv(img1 * img2) - mu1_mu2
    ssim_map = ((2 * mu1_mu2 + C1) * (2 * sigma12 + C2)) / (
        (mu1_sq + mu2_sq + C1) * (sigma1_sq + sigma2_sq + C2))
    return jnp.mean(ssim_map)


if __name__ == "__main__":
    key = jax.random.PRNGKey(0)
    k1, k2 = jax.random.split(key)
    B, C, H, W = 2, 4, 16, 16
    img1 = jax.random.uniform(k1, (B, C, H, W), dtype=jnp.float32)
    img2 = jnp.clip(img1 + 0.05 * jax.random.normal(k2, (B, C, H, W), dtype=jnp.float32), 0.0, 1.0)

    out = ssim_pallas(img1, img2)
    out = jax.block_until_ready(out)

    ref = jax.block_until_ready(ssim_ref(img1, img2))
    # Tolerance leaves headroom for MXU multi-pass f32 rounding of the conv
    # matmuls and the approx-reciprocal + Newton step; real structural bugs
    # (padding/packing/orientation) would be >1e-2 here.
    np.testing.assert_allclose(np.asarray(out), np.asarray(ref), rtol=2e-3, atol=1e-4)

    print("KERNEL_OK")
</pallas_src>

<mosaic_0001>
module attributes {stable_mosaic.version = 11 : i64} {
  func.func @kernel(%arg0: i32, %arg1: memref<80x80xf32, #tpu.memory_space<vmem>>, %arg2: memref<128x128xf32, #tpu.memory_space<vmem>>, %arg3: memref<1x16x128xf32, #tpu.memory_space<vmem>>, %arg4: memref<1x16x128xf32, #tpu.memory_space<vmem>>, %arg5: memref<1x1x128xf32, #tpu.memory_space<vmem>>, %arg6: memref<80x128xf32, #tpu.memory_space<vmem>>, %arg7: memref<80x128xf32, #tpu.memory_space<vmem>>) attributes {dimension_semantics = [#tpu.dimension_semantics<parallel>], iteration_bounds = array<i64: 1>, scalar_prefetch = 0 : i64, scratch_operands = 2 : i64, tpu.core_type = #tpu.core_type<tc>, window_params = [{pipeline_mode = #tpu.pipeline_mode<synchronous>, transform_indices = @transform_0, window_bounds = array<i64: 80, 80>}, {pipeline_mode = #tpu.pipeline_mode<synchronous>, transform_indices = @transform_1, window_bounds = array<i64: 128, 128>}, {transform_indices = @transform_2, window_bounds = array<i64: 1, 16, 128>}, {transform_indices = @transform_3, window_bounds = array<i64: 1, 16, 128>}, {transform_indices = @transform_4, window_bounds = array<i64: 1, 1, 128>}]} {
    %c0 = arith.constant 0 : index
    %c0_0 = arith.constant 0 : index
    %c0_1 = arith.constant 0 : index
    %0 = vector.load %arg3[%c0, %c0_0, %c0_1] : memref<1x16x128xf32, #tpu.memory_space<vmem>>, vector<1x16x128xf32>
    %1 = vector.shape_cast %0 : vector<1x16x128xf32> to vector<16x128xf32>
    %c0_2 = arith.constant 0 : index
    %c0_3 = arith.constant 0 : index
    %c0_4 = arith.constant 0 : index
    %2 = vector.load %arg4[%c0_2, %c0_3, %c0_4] : memref<1x16x128xf32, #tpu.memory_space<vmem>>, vector<1x16x128xf32>
    %3 = vector.shape_cast %2 : vector<1x16x128xf32> to vector<16x128xf32>
    %c0_5 = arith.constant 0 : index
    %c0_6 = arith.constant 0 : index
    %4 = vector.load %arg6[%c0_5, %c0_6] : memref<80x128xf32, #tpu.memory_space<vmem>>, vector<16x128xf32>
    tpu.vector_store %arg6[%c0_5, %c0_6], %1 {strides = array<i32>} : memref<80x128xf32, #tpu.memory_space<vmem>>, vector<16x128xf32>,
    %c16 = arith.constant 16 : index
    %c0_7 = arith.constant 0 : index
    %5 = vector.load %arg6[%c16, %c0_7] : memref<80x128xf32, #tpu.memory_space<vmem>>, vector<16x128xf32>
    tpu.vector_store %arg6[%c16, %c0_7], %3 {strides = array<i32>} : memref<80x128xf32, #tpu.memory_space<vmem>>, vector<16x128xf32>,
    %6 = arith.mulf %1, %1 : vector<16x128xf32>
    %c32 = arith.constant 32 : index
    %c0_8 = arith.constant 0 : index
    %7 = vector.load %arg6[%c32, %c0_8] : memref<80x128xf32, #tpu.memory_space<vmem>>, vector<16x128xf32>
    tpu.vector_store %arg6[%c32, %c0_8], %6 {strides = array<i32>} : memref<80x128xf32, #tpu.memory_space<vmem>>, vector<16x128xf32>,
    %8 = arith.mulf %3, %3 : vector<16x128xf32>
    %c48 = arith.constant 48 : index
    %c0_9 = arith.constant 0 : index
    %9 = vector.load %arg6[%c48, %c0_9] : memref<80x128xf32, #tpu.memory_space<vmem>>, vector<16x128xf32>
    tpu.vector_store %arg6[%c48, %c0_9], %8 {strides = array<i32>} : memref<80x128xf32, #tpu.memory_space<vmem>>, vector<16x128xf32>,
    %10 = arith.mulf %1, %3 : vector<16x128xf32>
    %c64 = arith.constant 64 : index
    %c0_10 = arith.constant 0 : index
    %11 = vector.load %arg6[%c64, %c0_10] : memref<80x128xf32, #tpu.memory_space<vmem>>, vector<16x128xf32>
    tpu.vector_store %arg6[%c64, %c0_10], %10 {strides = array<i32>} : memref<80x128xf32, #tpu.memory_space<vmem>>, vector<16x128xf32>,
    %c0_11 = arith.constant 0 : index
    %c0_12 = arith.constant 0 : index
    %12 = vector.load %arg1[%c0_11, %c0_12] : memref<80x80xf32, #tpu.memory_space<vmem>>, vector<80x80xf32>
    %c0_13 = arith.constant 0 : index
    %c0_14 = arith.constant 0 : index
    %13 = vector.load %arg6[%c0_13, %c0_14] : memref<80x128xf32, #tpu.memory_space<vmem>>, vector<80x128xf32>
    %cst = arith.constant dense<0.000000e+00> : vector<80x128xf32>
    %14 = tpu.matmul %12, %13, %cst {dimension_numbers = #tpu.dot_dimension_numbers<[1], [0], [0], [1], [0, 0, 1, 1], [], []>} : vector<80x80xf32>, vector<80x128xf32>, vector<80x128xf32> -> vector<80x128xf32>
    %c0_15 = arith.constant 0 : index
    %c0_16 = arith.constant 0 : index
    %15 = vector.load %arg7[%c0_15, %c0_16] : memref<80x128xf32, #tpu.memory_space<vmem>>, vector<80x128xf32>
    tpu.vector_store %arg7[%c0_15, %c0_16], %14 {strides = array<i32>} : memref<80x128xf32, #tpu.memory_space<vmem>>, vector<80x128xf32>,
    %c0_17 = arith.constant 0 : index
    %c0_18 = arith.constant 0 : index
    %16 = vector.load %arg7[%c0_17, %c0_18] : memref<80x128xf32, #tpu.memory_space<vmem>>, vector<80x128xf32>
    %c0_19 = arith.constant 0 : index
    %c0_20 = arith.constant 0 : index
    %17 = vector.load %arg2[%c0_19, %c0_20] : memref<128x128xf32, #tpu.memory_space<vmem>>, vector<128x128xf32>
    %cst_21 = arith.constant dense<0.000000e+00> : vector<80x128xf32>
    %18 = tpu.matmul %16, %17, %cst_21 {dimension_numbers = #tpu.dot_dimension_numbers<[1], [0], [0], [1], [0, 0, 1, 1], [], []>} : vector<80x128xf32>, vector<128x128xf32>, vector<80x128xf32> -> vector<80x128xf32>
    %19 = vector.extract_strided_slice %18 {offsets = [0, 0], sizes = [16, 128], strides = [1, 1]} : vector<80x128xf32> to vector<16x128xf32>
    %20 = vector.extract_strided_slice %18 {offsets = [16, 0], sizes = [16, 128], strides = [1, 1]} : vector<80x128xf32> to vector<16x128xf32>
    %21 = vector.extract_strided_slice %18 {offsets = [32, 0], sizes = [16, 128], strides = [1, 1]} : vector<80x128xf32> to vector<16x128xf32>
    %22 = vector.extract_strided_slice %18 {offsets = [48, 0], sizes = [16, 128], strides = [1, 1]} : vector<80x128xf32> to vector<16x128xf32>
    %23 = vector.extract_strided_slice %18 {offsets = [64, 0], sizes = [16, 128], strides = [1, 1]} : vector<80x128xf32> to vector<16x128xf32>
    %24 = arith.mulf %19, %19 : vector<16x128xf32>
    %25 = arith.mulf %20, %20 : vector<16x128xf32>
    %26 = arith.mulf %19, %20 : vector<16x128xf32>
    %27 = arith.subf %21, %24 : vector<16x128xf32>
    %28 = arith.subf %22, %25 : vector<16x128xf32>
    %29 = arith.subf %23, %26 : vector<16x128xf32>
    %cst_22 = arith.constant 2.000000e+00 : f32
    %30 = vector.broadcast %cst_22 : f32 to vector<16x128xf32>
    %31 = arith.mulf %30, %26 : vector<16x128xf32>
    %cst_23 = arith.constant 9.99999974E-5 : f32
    %32 = vector.broadcast %cst_23 : f32 to vector<16x128xf32>
    %33 = arith.addf %31, %32 : vector<16x128xf32>
    %cst_24 = arith.constant 2.000000e+00 : f32
    %34 = vector.broadcast %cst_24 : f32 to vector<16x128xf32>
    %35 = arith.mulf %34, %29 : vector<16x128xf32>
    %cst_25 = arith.constant 8.99999984E-4 : f32
    %36 = vector.broadcast %cst_25 : f32 to vector<16x128xf32>
    %37 = arith.addf %35, %36 : vector<16x128xf32>
    %38 = arith.mulf %33, %37 : vector<16x128xf32>
    %39 = arith.addf %24, %25 : vector<16x128xf32>
    %cst_26 = arith.constant 9.99999974E-5 : f32
    %40 = vector.broadcast %cst_26 : f32 to vector<16x128xf32>
    %41 = arith.addf %39, %40 : vector<16x128xf32>
    %42 = arith.addf %27, %28 : vector<16x128xf32>
    %cst_27 = arith.constant 8.99999984E-4 : f32
    %43 = vector.broadcast %cst_27 : f32 to vector<16x128xf32>
    %44 = arith.addf %42, %43 : vector<16x128xf32>
    %45 = arith.mulf %41, %44 : vector<16x128xf32>
    %46 = tpu.reciprocal %45 {approx = true} : vector<16x128xf32> -> vector<16x128xf32>
    %47 = arith.mulf %45, %46 : vector<16x128xf32>
    %cst_28 = arith.constant 2.000000e+00 : f32
    %48 = vector.broadcast %cst_28 : f32 to vector<16x128xf32>
    %49 = arith.subf %48, %47 : vector<16x128xf32>
    %50 = arith.mulf %46, %49 : vector<16x128xf32>
    %51 = arith.mulf %38, %50 : vector<16x128xf32>
    %cst_29 = arith.constant dense<0.000000e+00> : vector<128xf32>
    %52 = vector.multi_reduction <add>, %51, %cst_29 [0] : vector<16x128xf32> to vector<128xf32>
    %53 = vector.shape_cast %52 : vector<128xf32> to vector<1x128xf32>
    %c0_30 = arith.constant 0 : index
    %c0_31 = arith.constant 0 : index
    %c0_32 = arith.constant 0 : index
    %54 = vector.load %arg5[%c0_30, %c0_31, %c0_32] : memref<1x1x128xf32, #tpu.memory_space<vmem>>, vector<1x1x128xf32>
    %55 = vector.shape_cast %54 : vector<1x1x128xf32> to vector<1x128xf32>
    %56 = vector.shape_cast %53 : vector<1x128xf32> to vector<1x1x128xf32>
    tpu.vector_store %arg5[%c0_30, %c0_31, %c0_32], %56 {strides = array<i32>} : memref<1x1x128xf32, #tpu.memory_space<vmem>>, vector<1x1x128xf32>,
    return
  }
  func.func @transform_0(%arg0: i32) -> (i32, i32) {
    %c0_i32 = arith.constant 0 : i32
    %c0_i32_0 = arith.constant 0 : i32
    %c0_i32_1 = arith.constant 0 : i32
    return %c0_i32, %c0_i32_0 : i32, i32
  }
  func.func @transform_1(%arg0: i32) -> (i32, i32) {
    %c0_i32 = arith.constant 0 : i32
    %c0_i32_0 = arith.constant 0 : i32
    %c0_i32_1 = arith.constant 0 : i32
    return %c0_i32, %c0_i32_0 : i32, i32
  }
  func.func @transform_2(%arg0: i32) -> (i32, i32, i32) {
    %c0_i32 = arith.constant 0 : i32
    %c0_i32_0 = arith.constant 0 : i32
    %c0_i32_1 = arith.constant 0 : i32
    return %arg0, %c0_i32, %c0_i32_0 : i32, i32, i32
  }
  func.func @transform_3(%arg0: i32) -> (i32, i32, i32) {
    %c0_i32 = arith.constant 0 : i32
    %c0_i32_0 = arith.constant 0 : i32
    %c0_i32_1 = arith.constant 0 : i32
    return %arg0, %c0_i32, %c0_i32_0 : i32, i32, i32
  }
  func.func @transform_4(%arg0: i32) -> (i32, i32, i32) {
    %c0_i32 = arith.constant 0 : i32
    %c0_i32_0 = arith.constant 0 : i32
    %c0_i32_1 = arith.constant 0 : i32
    return %arg0, %c0_i32, %c0_i32_0 : i32, i32, i32
  }
}

</mosaic_0001>

<bundles_post_ra>
// kernel: tpu_custom_call.1
= control target key start
LH: loop header
LB: loop body
LE: loop exit
PB: predicated region body
PF: predicated region fallthrough
CT: control target
= control target key end

     0   :  { %9 = vsyncpa [#allocation5], 0  ;;  %s924_s0 = inlined_call_operand.hbm [shape: f32[80,80], index: 0, kind: input, shape index: {}]   ;;  %s925_s1 = inlined_call_operand.hbm [shape: f32[128,128], index: 1, kind: input, shape index: {}]   ;;  %s926_s2 = inlined_call_operand.hbm [shape: f32[1,16,128], index: 2, kind: input, shape index: {}]   ;;  %s927_s3 = inlined_call_operand.hbm [shape: f32[1,16,128], index: 3, kind: input, shape index: {}]   ;;  %s928_s4 = inlined_call_operand.hbm [shape: f32[1,1,128], index: 4, kind: output, shape index: {}]  }
   0x1   :  { %10 = vsyncpa [#allocation8], 0 }
   0x2   :  { %11 = vsyncpa [#allocation11], 0 }
   0x3   :  { %12 = vsyncpa [#allocation6], 0  ;;  %s796_s15 = smov [#allocation7]   ;;  %s797_s17 = smov [#allocation4]  }
   0x4   :  { %s30_s16 = sshll.u32 %s796_s15, 4  ;;  %s18_s18 = sshll.u32 %s797_s17, 4  ;;  %s31_s16 = int_to_ptr.vmem [resolvable:$true] %s30_s16  ;;  %s828_s18 = int_to_ptr.vmem [resolvable:$true] %s18_s18 }
   0x5   :  { %s678_s21 = scalar_lea.hbm %s925_s1, 2048 }
   0x6   :  { %p679_p0 = scmp.ne.s32.totalorder %s925_s1, %s678_s21  ;;  %p682_p1 = scmp.lt.u32.totalorder %s678_s21, %s925_s1 }
   0x8   :  { %p684_p2 = pnand %p682_p1, %p679_p0 }
   0xa   :  { %687 = shalt.err (!%p684_p2)
}
   0xb   :  { %s688_s26 = scalar_lea.vmem %s31_s16, 2048  ;;  %p693_p4 = scmp.lt.s32.totalorder %s31_s16, %s31_s16 }
   0xc   :  { %p689_p3 = scmp.ne.s32.totalorder %s31_s16, %s688_s26  ;;  %p694_p5 = scmp.lt.s32.totalorder %s688_s26, %s688_s26 }
   0xe   :  { %p695_p6 = por %p694_p5, %p693_p4 }
  0x10   :  { %p696_p7 = pnand %p695_p6, %p689_p3 }
  0x12   :  { %699 = shalt.err (!%p696_p7)
}
  0x13   :  { %s798_s27 = smov 128   ;;  %s799_s28 = smov 8  }
  0x14   :  { %36 = dma.hbm_to_vmem [thread:$0]  %s925_s1, 2048, %s31_s16, [#allocation8], %s798_s27, %s798_s27, %s799_s28  }
  0x15   :  { %s700_s7 = scalar_lea.hbm %s924_s0, 1280 }
  0x16   :  { %p701_p8 = scmp.ne.s32.totalorder %s924_s0, %s700_s7  ;;  %p704_p9 = scmp.lt.u32.totalorder %s700_s7, %s924_s0 }
  0x18   :  { %p706_p10 = pnand %p704_p9, %p701_p8 }
  0x1a   :  { %709 = shalt.err (!%p706_p10)
}
  0x1b   :  { %s710_s12 = scalar_lea.vmem %s828_s18, 1280  ;;  %p715_p12 = scmp.lt.s32.totalorder %s828_s18, %s828_s18 }
  0x1c   :  { %p711_p11 = scmp.ne.s32.totalorder %s828_s18, %s710_s12  ;;  %p716_p13 = scmp.lt.s32.totalorder %s710_s12, %s710_s12 }
  0x1e   :  { %p717_p0 = por %p716_p13, %p715_p12 }
  0x20   :  { %p718_p1 = pnand %p717_p0, %p711_p11 }
  0x22   :  { %721 = shalt.err (!%p718_p1)
}
  0x23   :  { %24 = dma.hbm_to_vmem [thread:$0]  %s924_s0, 1280, %s828_s18, [#allocation5], %s798_s27, %s798_s27, %s799_s28  }
  0x24   :  { %s800_s14 = smov [#allocation9]   ;;  %s801_s16 = smov [#allocation10]  }
  0x25   :  { %s42_s15 = sshll.u32 %s800_s14, 4  ;;  %s54_s17 = sshll.u32 %s801_s16, 4  ;;  %s43_s15 = int_to_ptr.vmem [resolvable:$true] %s42_s15  ;;  %s865_s17 = int_to_ptr.vmem [resolvable:$true] %s54_s17 }
  0x26   :  { %s722_s21 = scalar_lea.hbm %s926_s2, 256 }
  0x27   :  { %p723_p2 = scmp.ne.s32.totalorder %s926_s2, %s722_s21  ;;  %p726_p3 = scmp.lt.u32.totalorder %s722_s21, %s926_s2 }
  0x29   :  { %p728_p4 = pnand %p726_p3, %p723_p2 }
  0x2b   :  { %731 = shalt.err (!%p728_p4)
}
  0x2c   :  { %s732_s0 = scalar_lea.vmem %s43_s15, 256  ;;  %p737_p6 = scmp.lt.s32.totalorder %s43_s15, %s43_s15 }
  0x2d   :  { %p733_p5 = scmp.ne.s32.totalorder %s43_s15, %s732_s0  ;;  %p738_p7 = scmp.lt.s32.totalorder %s732_s0, %s732_s0 }
  0x2f   :  { %p739_p8 = por %p738_p7, %p737_p6 }
  0x31   :  { %p740_p9 = pnand %p739_p8, %p733_p5 }
  0x33   :  { %743 = shalt.err (!%p740_p9)
}
  0x34   :  { %48 = dma.hbm_to_vmem [thread:$0]  %s926_s2, 256, %s43_s15, [#allocation8], %s798_s27, %s798_s27, %s799_s28  }
  0x35   :  { %s744_s5 = scalar_lea.hbm %s927_s3, 256 }
  0x36   :  { %p745_p10 = scmp.ne.s32.totalorder %s927_s3, %s744_s5  ;;  %p748_p11 = scmp.lt.u32.totalorder %s744_s5, %s927_s3 }
  0x38   :  { %p750_p12 = pnand %p748_p11, %p745_p10 }
  0x3a   :  { %753 = shalt.err (!%p750_p12)
}
  0x3b   :  { %s754_s10 = scalar_lea.vmem %s865_s17, 256  ;;  %p759_p0 = scmp.lt.s32.totalorder %s865_s17, %s865_s17 }
  0x3c   :  { %p755_p13 = scmp.ne.s32.totalorder %s865_s17, %s754_s10  ;;  %p760_p1 = scmp.lt.s32.totalorder %s754_s10, %s754_s10 }
  0x3e   :  { %p761_p2 = por %p760_p1, %p759_p0 }
  0x40   :  { %p762_p3 = pnand %p761_p2, %p755_p13 }
  0x42   :  { %765 = shalt.err (!%p762_p3)
}
  0x43   :  { %60 = dma.hbm_to_vmem [thread:$0]  %s927_s3, 256, %s865_s17, [#allocation11], %s798_s27, %s798_s27, %s799_s28  }
  0x44   :  { %788 = dma.done.wait [#allocation5], 1280  }
  0x45   :  { %789 = vsyncadd [#allocation5], 4294966016 }
  0x46   :  { %790 = dma.done.wait [#allocation8], 2304  }
  0x47   :  { %791 = vsyncadd [#allocation8], 4294964992 }
  0x48   :  { %792 = dma.done.wait [#allocation11], 256  }
  0x49   :  { %793 = vsyncadd [#allocation11], 4294967040  ;;  %vm113_vm0 = vcmask 654336   ;;  %v73_v0 = vld [vmem:[#allocation9] sm:$0xff]  ;;  %v74_v1 = vld [vmem:[#allocation9 + $0x8] sm:$0xff]  ;;  %s802_s3 = smov [#allocation12]  }
  0x4a   :  { %v75_v2 = vld [vmem:[#allocation10] sm:$0xff]  ;;  %v615_v3 = vpack.c.bf16 %v74_v1, %v73_v0  ;;  %v76_v4 = vld [vmem:[#allocation10 + $0x8] sm:$0xff]  ;;  %v81_v5 = vmul.f32 %v73_v0, %v73_v0  ;;  %v82_v6 = vmul.f32 %v74_v1, %v74_v1  ;;  %v279_v9 = vld [vmem:[#allocation7] sm:$0xff]  ;;  %s466_s27 = sshll.u32 %s802_s3, 4  ;;  %s467_s27 = int_to_ptr.vmem [resolvable:$true] %s466_s27 }
  0x4b   :  { %v93_v7 = vld [vmem:[#allocation4] sm:$0xff]  ;;  %v619_v8 = vpack.c.bf16 %v76_v4, %v75_v2  ;;  %v85_v11 = vmul.f32 %v75_v2, %v75_v2  ;;  %v86_v12 = vmul.f32 %v76_v4, %v76_v4  ;;  %v280_v13 = vld [vmem:[#allocation7 + $0x8] sm:$0xff]  ;;  %v282_v15 = vld [vmem:[#allocation7 + $0x18] sm:$0xff]  ;;  %v89_v21 = vmul.f32 %v75_v2, %v73_v0  ;;  %s766_s28 = scalar_lea.vmem %s467_s27, 16  ;;  %s770_s12 = scalar_lea.vmem %s467_s27, 32 }
  0x4c   :  { %553 = vmatprep.mubr.msk.f32.mxu0 %vm113_vm0, %v93_v7  ;;  %616 = vmatprep.subr.bf16.mxu0 %v615_v3  ;;  %v623_v10 = vpack.c.bf16 %v82_v6, %v81_v5  ;;  %v281_v14 = vld [vmem:[#allocation7 + $0x10] sm:$0xff]  ;;  %v635_v16 = vpack.c.bf16 %v280_v13, %v279_v9  ;;  %v283_v18 = vld [vmem:[#allocation7 + $0x20] sm:$0xff]  ;;  %v284_v19 = vld [vmem:[#allocation7 + $0x28] sm:$0xff]  ;;  %v90_v22 = vmul.f32 %v76_v4, %v74_v1  ;;  %p767_p4 = scmp.ne.s32.totalorder %s467_s27, %s766_s28  ;;  %p771_p5 = scmp.lt.s32.totalorder %s467_s27, %s467_s27 }
  0x4d   :  { %618 = vmatpush3.bf16.msra.mxu0 %v615_v3  ;;  %v639_v17 = vpack.c.bf16 %v282_v15, %v281_v14  ;;  %v627_v20 = vpack.c.bf16 %v86_v12, %v85_v11  ;;  %v643_v23 = vpack.c.bf16 %v284_v19, %v283_v18  ;;  %v285_v24 = vld [vmem:[#allocation7 + $0x30] sm:$0xff]  ;;  %v286_v25 = vld [vmem:[#allocation7 + $0x38] sm:$0xff]  ;;  %v287_v28 = vld [vmem:[#allocation7 + $0x40] sm:$0xff]  ;;  %p772_p6 = scmp.lt.s32.totalorder %s770_s12, %s766_s28 }
  0x4e   :  { %620 = vmatprep.subr.bf16.mxu0 %v619_v8  ;;  %636 = vmatprep.subr.bf16.mxu1 %v635_v16  ;;  %v631_v26 = vpack.c.bf16 %v90_v22, %v89_v21  ;;  %v647_v27 = vpack.c.bf16 %v286_v25, %v285_v24  ;;  %v288_v29 = vld [vmem:[#allocation7 + $0x48] sm:$0xff]  ;;  %v289_v31 = vld [vmem:[#allocation7 + $0x50] sm:$0xff]  ;;  %v290_v32 = vld [vmem:[#allocation7 + $0x58] sm:$0xff] }
  0x4f   :  { %638 = vmatpush3.bf16.msra.mxu1 %v635_v16  ;;  %v651_v30 = vpack.c.bf16 %v288_v29, %v287_v28  ;;  %v94_v33 = vld [vmem:[#allocation4 + $0x8] sm:$0xff]  ;;  %v95_v34 = vld [vmem:[#allocation4 + $0x10] sm:$0xff]  ;;  %v655_v35 = vpack.c.bf16 %v290_v32, %v289_v31  ;;  %v292_v37 = vld [vmem:[#allocation7 + $0x68] sm:$0xff]  ;;  %p773_p7 = por %p772_p6, %p771_p5 }
  0x50   :  { %640 = vmatprep.subr.bf16.mxu1 %v639_v17  ;;  %v291_v36 = vld [vmem:[#allocation7 + $0x60] sm:$0xff]  ;;  %v96_v38 = vld [vmem:[#allocation4 + $0x18] sm:$0xff]  ;;  %v97_v39 = vld [vmem:[#allocation4 + $0x20] sm:$0xff] }
  0x51   :  { %622 = vmatpush3.bf16.msra.mxu0 %v619_v8  ;;  %v659_v40 = vpack.c.bf16 %v292_v37, %v291_v36  ;;  %v293_v41 = vld [vmem:[#allocation7 + $0x70] sm:$0xff]  ;;  %v294_v42 = vld [vmem:[#allocation7 + $0x78] sm:$0xff]  ;;  %v99_v44 = vld [vmem:[#allocation4 + $0x30] sm:$0xff]  ;;  %p774_p8 = pnand %p773_p7, %p767_p4 }
  0x52   :  { %624 = vmatprep.subr.bf16.mxu0 %v623_v10  ;;  %v98_v43 = vld [vmem:[#allocation4 + $0x28] sm:$0xff]  ;;  %v663_v45 = vpack.c.bf16 %v294_v42, %v293_v41  ;;  %v100_v46 = vld [vmem:[#allocation4 + $0x38] sm:$0xff]  ;;  %v101_v47 = vld [vmem:[#allocation4 + $0x40] sm:$0xff] }
  0x53   :  { %642 = vmatpush3.bf16.msra.mxu1 %v639_v17  ;;  %v102_v48 = vld [vmem:[#allocation4 + $0x48] sm:$0xff] }
  0x54   :  { %644 = vmatprep.subr.bf16.mxu1 %v643_v23 }
  0x55   :  { %626 = vmatpush3.bf16.msra.mxu0 %v623_v10 }
  0x56   :  { %628 = vmatprep.subr.bf16.mxu0 %v627_v20 }
  0x57   :  { %646 = vmatpush3.bf16.msra.mxu1 %v643_v23 }
  0x58   :  { %648 = vmatprep.subr.bf16.mxu1 %v647_v27 }
  0x59   :  { %630 = vmatpush3.bf16.msra.mxu0 %v627_v20 }
  0x5a   :  { %632 = vmatprep.subr.bf16.mxu0 %v631_v26 }
  0x5b   :  { %650 = vmatpush3.bf16.msra.mxu1 %v647_v27 }
  0x5c   :  { %652 = vmatprep.subr.bf16.mxu1 %v651_v30 }
  0x5d   :  { %634 = vmatpush3.bf16.msra.mxu0 %v631_v26 }
  0x5f   :  { %654 = vmatpush3.bf16.msra.mxu1 %v651_v30 }
  0x60   :  { %554 = vmatmul.mubr.msk.f32.vlgmr.msra.gmra.mrb[0].mxu0 %vm113_vm0, %v94_v33  ;;  %656 = vmatprep.subr.bf16.mxu1 %v655_v35 }
  0x61   :  { %556 = vmatprep.mubr.msk.f32.mxu0 %vm113_vm0, %v95_v34 }
  0x63   :  { %658 = vmatpush3.bf16.msra.mxu1 %v655_v35 }
  0x64   :  { %557 = vmatmul.mubr.msk.f32.gmra.mrb[2].mxu0 %vm113_vm0, %v96_v38  ;;  %660 = vmatprep.subr.bf16.mxu1 %v659_v40 }
  0x65   :  { %559 = vmatprep.mubr.msk.f32.mxu0 %vm113_vm0, %v97_v39 }
  0x67   :  { %662 = vmatpush3.bf16.msra.mxu1 %v659_v40 }
  0x68   :  { %560 = vmatmul.mubr.msk.f32.gmra.mrb[4].mxu0 %vm113_vm0, %v98_v43  ;;  %664 = vmatprep.subr.bf16.mxu1 %v663_v45 }
  0x69   :  { %562 = vmatprep.mubr.msk.f32.mxu0 %vm113_vm0, %v99_v44 }
  0x6b   :  { %666 = vmatpush3.bf16.msra.mxu1 %v663_v45 }
  0x6c   :  { %563 = vmatmul.mubr.msk.f32.gmra.mrb[6].mxu0 %vm113_vm0, %v100_v46 }
  0x6d   :  { %565 = vmatprep.mubr.msk.f32.mxu0 %vm113_vm0, %v101_v47 }
  0x70   :  { %566 = vmatmul.mubr.msk.f32.gmra.mrb[8].mxu0 %vm113_vm0, %v102_v48 }
 0x133   :  { %v555_v49 = vpop.f32.mrb[0].mxu0 }
 0x134   :  { %v210_v50 = vpop.f32.mrb[1].mxu0 }
 0x135   :  { %600 = vmatprep.mubr.f32.mxu1 %v210_v50 }
 0x136   :  { %601 = vmatmul.mubr.f32.vlgmr.msra.gmra.mrb[0].mxu1 %v555_v49 }
 0x137   :  { %v558_v51 = vpop.f32.mrb[2].mxu0 }
 0x138   :  { %v220_v52 = vpop.f32.mrb[3].mxu0 }
 0x139   :  { %603 = vmatprep.mubr.f32.mxu1 %v220_v52 }
 0x13a   :  { %604 = vmatmul.mubr.f32.gmra.mrb[2].mxu1 %v558_v51 }
 0x13b   :  { %v561_v53 = vpop.f32.mrb[4].mxu0 }
 0x13c   :  { %v230_v54 = vpop.f32.mrb[5].mxu0 }
 0x13d   :  { %606 = vmatprep.mubr.f32.mxu1 %v230_v54 }
 0x13e   :  { %607 = vmatmul.mubr.f32.gmra.mrb[4].mxu1 %v561_v53 }
 0x13f   :  { %v564_v55 = vpop.f32.mrb[6].mxu0 }
 0x140   :  { %v240_v56 = vpop.f32.mrb[7].mxu0 }
 0x141   :  { %609 = vmatprep.mubr.f32.mxu1 %v240_v56 }
 0x142   :  { %610 = vmatmul.mubr.f32.gmra.mrb[6].mxu1 %v564_v55 }
 0x143   :  { %v567_v57 = vpop.f32.mrb[8].mxu0 }
 0x144   :  { %v250_v58 = vpop.f32.mrb[9].mxu0 }
 0x145   :  { %612 = vmatprep.mubr.f32.mxu1 %v250_v58 }
 0x146   :  { %613 = vmatmul.mubr.f32.gmra.mrb[8].mxu1 %v567_v57 }
 0x209   :  { %v602_v59 = vpop.f32.mrb[0].mxu1 }
 0x20a   :  { %v361_v60 = vpop.f32.mrb[1].mxu1  ;;  %v411_v62 = vmul.f32 %v602_v59, %v602_v59 }
 0x20b   :  { %v410_v2 = vmul.f32 %v361_v60, %v361_v60 }
 0x20d   :  { %v605_v61 = vpop.f32.mrb[2].mxu1 }
 0x20e   :  { %v413_v63 = vmul.f32 %v605_v61, %v605_v61  ;;  %v415_v0 = vmul.f32 %v605_v61, %v602_v59  ;;  %v371_v1 = vpop.f32.mrb[3].mxu1 }
 0x20f   :  { %v412_v3 = vmul.f32 %v371_v1, %v371_v1  ;;  %v414_v4 = vmul.f32 %v371_v1, %v361_v60 }
 0x210   :  { %v433_v5 = vadd.f32 %v413_v63, %v411_v62  ;;  %v423_v18 = vmul.f32 2.0, %v415_v0 }
 0x211   :  { %v432_v6 = vadd.f32 %v412_v3, %v410_v2  ;;  %v608_v7 = vpop.f32.mrb[4].mxu1  ;;  %v422_v23 = vmul.f32 2.0, %v414_v4 }
 0x212   :  { %v417_v8 = vsub.f32 %v608_v7, %v411_v62  ;;  %v381_v9 = vpop.f32.mrb[5].mxu1  ;;  %v435_v19 = vadd.f32 0.0001, %v433_v5  ;;  %v425_v31 = vadd.f32 0.0001, %v423_v18 }
 0x213   :  { %v416_v10 = vsub.f32 %v381_v9, %v410_v2  ;;  %v434_v24 = vadd.f32 0.0001, %v432_v6  ;;  %v424_v33 = vadd.f32 0.0001, %v422_v23 }
 0x215   :  { %v611_v11 = vpop.f32.mrb[6].mxu1 }
 0x216   :  { %v419_v12 = vsub.f32 %v611_v11, %v413_v63  ;;  %v391_v13 = vpop.f32.mrb[7].mxu1 }
 0x217   :  { %v418_v14 = vsub.f32 %v391_v13, %v412_v3 }
 0x218   :  { %v437_v15 = vadd.f32 %v419_v12, %v417_v8 }
 0x219   :  { %v436_v16 = vadd.f32 %v418_v14, %v416_v10  ;;  %v614_v17 = vpop.f32.mrb[8].mxu1 }
 0x21a   :  { %v439_v20 = vadd.f32 0.0009, %v437_v15  ;;  %v421_v21 = vsub.f32 %v614_v17, %v415_v0  ;;  %v401_v22 = vpop.f32.mrb[9].mxu1 }
 0x21b   :  { %v438_v25 = vadd.f32 0.0009, %v436_v16  ;;  %v420_v26 = vsub.f32 %v401_v22, %v414_v4 }
 0x21c   :  { %v441_v27 = vmul.f32 %v439_v20, %v435_v19  ;;  %v427_v28 = vmul.f32 2.0, %v421_v21 }
 0x21d   :  { %v440_v29 = vmul.f32 %v438_v25, %v434_v24  ;;  %v426_v30 = vmul.f32 2.0, %v420_v26 }
 0x21e   :  { %674 = vrcp.f32 %v441_v27  ;;  %v429_v32 = vadd.f32 0.0009, %v427_v28 }
 0x21f   :  { %676 = vrcp.f32 %v440_v29  ;;  %v428_v34 = vadd.f32 0.0009, %v426_v30 }
 0x220   :  { %v431_v35 = vmul.f32 %v429_v32, %v425_v31 }
 0x221   :  { %v430_v36 = vmul.f32 %v428_v34, %v424_v33 }
 0x228   :  { %v675_v37 = vpop.eup %674 }
 0x229   :  { %v677_v38 = vpop.eup %676  ;;  %v445_v39 = vmul.f32 %v675_v37, %v441_v27 }
 0x22a   :  { %v444_v40 = vmul.f32 %v677_v38, %v440_v29 }
 0x22b   :  { %v447_v41 = vsub.f32 2.0, %v445_v39 }
 0x22c   :  { %v446_v42 = vsub.f32 2.0, %v444_v40 }
 0x22d   :  { %v449_v43 = vmul.f32 %v675_v37, %v447_v41 }
 0x22e   :  { %v448_v44 = vmul.f32 %v677_v38, %v446_v42 }
 0x22f   :  { %v451_v45 = vmul.f32 %v449_v43, %v431_v35 }
 0x230   :  { %v450_v46 = vmul.f32 %v448_v44, %v430_v36 }
 0x232   :  { %v452_v47 = vadd.f32 %v451_v45, %v450_v46 }
 0x234   :  { %v453_v48 = vrot.slane %v452_v47, 4 }
 0x236   :  { %v454_v49 = vadd.f32 %v453_v48, %v452_v47 }
 0x238   :  { %v455_v50 = vrot.slane %v454_v49, 2 }
 0x23a   :  { %v456_v51 = vadd.f32 %v455_v50, %v454_v49 }
 0x23c   :  { %v457_v52 = vrot.slane %v456_v51, 1 }
 0x23e   :  { %v458_v53 = vadd.f32 %v457_v52, %v456_v51 }
 0x240   :  { %459 = vst [vmem:[#allocation12] sm:$0x1] %v458_v53 }
 0x241   :  { %777 = shalt.err (!%p774_p8)
}
 0x242   :  { %s778_s14 = scalar_lea.hbm %s928_s4, 16 }
 0x243   :  { %p779_p9 = scmp.ne.s32.totalorder %s928_s4, %s778_s14  ;;  %p782_p10 = scmp.lt.u32.totalorder %s778_s14, %s928_s4 }
 0x245   :  { %p784_p11 = pnand %p782_p10, %p779_p9 }
 0x247   :  { %787 = shalt.err (!%p784_p11)
}
 0x248   :  { %469 = dma.vmem_to_hbm [thread:$0]  %s467_s27, 16, %s928_s4, [#allocation6]  }
 0x249   :  { %794 = dma.done.wait [#allocation6], 16  }
 0x24a   :  { %795 = vsyncadd [#allocation6], 4294967280 }
 0x24b   :  { %473 = vsyncpa [#allocation5], 1 }
 0x24c   :  { %474 = vsyncpa [#allocation8], 1 }
 0x24d   :  { %475 = vsyncpa [#allocation11], 1 }
 0x24e   :  { %476 = vsyncpa [#allocation6], 1 }

</bundles_post_ra>
